<compile_context>
chip_gen: v7x
topology: tpu7x:2x2x1
jax: 0.10.0
libtpu: 0.0.40
codegen_flags: <defaults>
</compile_context>

<pallas_src>
import functools

import jax
import jax.numpy as jnp
from jax.experimental import pallas as pl
from jax.experimental.pallas import tpu as pltpu

EPS = 1e-20
_PASSTHROUGH_DTYPES = (jnp.bfloat16, jnp.float32)
_LANE_CANDIDATES = (512, 256, 128)   # lane-dense widths (multiples of 128)


def _ce_partial_kernel(y_ref, yp_ref, o_ref, *, total_rows, block_rows, need_mask):
    """Per-block partial: sum over rows (sublanes) of y * log(y_prim + eps).

    Writes a (1, 1, lane_w) lane-dense partial; the tiny (grid, 1, lane_w)
    partial tensor is summed and negated by XLA outside the kernel.
    """
    y = y_ref[...].astype(jnp.float32)
    yp = yp_ref[...].astype(jnp.float32)

    def partial_sum(yv, ypv):
        prod = yv * jnp.log(ypv + EPS)
        # Reduce only the row/sublane axis; keep the lane axis so the hot loop
        # has no cross-lane (XLU) reduction and stores stay unmasked.
        return jnp.sum(prod, axis=0, keepdims=True)[None]

    if not need_mask:
        o_ref[...] = partial_sum(y, yp)
    else:
        last = pl.num_programs(0) - 1

        @pl.when(pl.program_id(0) != last)
        def _():
            o_ref[...] = partial_sum(y, yp)

        @pl.when(pl.program_id(0) == last)
        def _():
            # Rows past the array extent in the ragged final block read
            # unspecified data: force their contribution to exactly 0 (mask
            # y_prim *before* the log so no NaN/Inf lanes are produced).
            row_ids = jax.lax.broadcasted_iota(jnp.int32, y.shape, 0)
            valid = (last * block_rows + row_ids) < total_rows
            o_ref[...] = partial_sum(jnp.where(valid, y, 0.0),
                                     jnp.where(valid, yp, 1.0))


def _flatten_lane_dense(y, y_prim):
    """Flatten both inputs to a lane-dense (rows, lane_w) view.

    If the element count divides a candidate lane width the reshape is a free
    view; otherwise only the small (< lane_w) tail is padded with
    (y=0, y_prim=1), which contributes exactly 0 to the loss.
    """
    y = jnp.asarray(y)
    y_prim = jnp.asarray(y_prim)
    if y.shape != y_prim.shape:
        raise ValueError(f"shape mismatch: {y.shape} vs {y_prim.shape}")
    if y.dtype not in _PASSTHROUGH_DTYPES:
        y = y.astype(jnp.float32)
    if y_prim.dtype not in _PASSTHROUGH_DTYPES:
        y_prim = y_prim.astype(jnp.float32)

    yf = jnp.ravel(y)
    ypf = jnp.ravel(y_prim)
    n = yf.shape[0]

    lane_w = _LANE_CANDIDATES[0]
    for cand in _LANE_CANDIDATES:
        if n >= cand and n % cand == 0:
            lane_w = cand
            break
    pad = (-n) % lane_w
    if pad:
        yf = jnp.pad(yf, (0, pad), constant_values=0.0)     # 0 * log(.) == 0
        ypf = jnp.pad(ypf, (0, pad), constant_values=1.0)   # log(1 + eps) finite
    rows = (n + pad) // lane_w
    return yf.reshape(rows, lane_w), ypf.reshape(rows, lane_w)


def _default_tile_bytes():
    # ~4 MiB f32 working set per input on v6e/v7x (32 MiB scoped-VMEM default),
    # ~2 MiB on the v5 generation (16 MiB scoped-VMEM default on v5e).
    try:
        kind = jax.devices()[0].device_kind.lower()
    except Exception:
        return 2 * 1024 * 1024
    if "v5" in kind:
        return 2 * 1024 * 1024
    return 4 * 1024 * 1024


def loss_cross_entropy(y, y_prim, *, target_tile_bytes=None):
    """Pallas equivalent of LossCrossEntropy.forward(y, y_prim)."""
    y2, yp2 = _flatten_lane_dense(y, y_prim)
    rows, lane_w = y2.shape

    if target_tile_bytes is None:
        target_tile_bytes = _default_tile_bytes()

    # Budget against the f32 working set per row (lane_w is a multiple of 128,
    # so this is the exact padded VMEM footprint, and it also leaves headroom
    # for the bf16 -> f32 upcast / product temporaries inside the kernel).
    bytes_per_row_f32 = lane_w * 4
    rows_budget = max(32, int(target_tile_bytes) // bytes_per_row_f32)

    if rows_budget >= rows:
        # Whole input would fit in one block.  If it is more than a couple of
        # MiB, still split into >= 2 blocks so the "parallel" grid axis lets
        # v7x's two TensorCores share the work (free on single-TC v5e/v6e).
        if rows * bytes_per_row_f32 > 2 * 1024 * 1024 and rows >= 64:
            half = ((pl.cdiv(rows, 2) + 31) // 32) * 32
            block_rows = half if half < rows else rows
        else:
            block_rows = rows                        # full extent: always legal
    else:
        block_rows = (rows_budget // 32) * 32        # legal sublanes for f32 & bf16
        block_rows = min(block_rows, rows)

    grid = pl.cdiv(rows, block_rows)
    need_mask = (rows % block_rows) != 0

    kernel = functools.partial(
        _ce_partial_kernel,
        total_rows=rows,
        block_rows=block_rows,
        need_mask=need_mask,
    )

    partials = pl.pallas_call(
        kernel,
        out_shape=jax.ShapeDtypeStruct((grid, 1, lane_w), jnp.float32),
        grid_spec=pltpu.PrefetchScalarGridSpec(
            num_scalar_prefetch=0,
            grid=(grid,),
            in_specs=[
                pl.BlockSpec((block_rows, lane_w), lambda i: (i, 0)),
                pl.BlockSpec((block_rows, lane_w), lambda i: (i, 0)),
            ],
            out_specs=pl.BlockSpec((1, 1, lane_w), lambda i: (i, 0, 0)),
        ),
        compiler_params=pltpu.CompilerParams(
            # Independent row blocks -> v7x megacore can shard the grid.
            dimension_semantics=("parallel",),
        ),
    )(y2, yp2)

    return -jnp.sum(partials)


if __name__ == "__main__":
    key = jax.random.PRNGKey(0)
    k1, k2, k3, k4, k5, k6 = jax.random.split(key, 6)

    def ref_loss(a, b):
        return -jnp.sum(a.astype(jnp.float32) * jnp.log(b.astype(jnp.float32) + EPS))

    # 1) basic f32 case: (batch, n_classes) distributions, single block.
    batch, n_classes = 8, 16
    y = jax.nn.softmax(jax.random.normal(k1, (batch, n_classes)) * 4.0, axis=-1)
    y_prim = jax.nn.softmax(jax.random.normal(k2, (batch, n_classes)), axis=-1)
    loss = jax.block_until_ready(loss_cross_entropy(y, y_prim))
    assert jnp.allclose(loss, ref_loss(y, y_prim), rtol=1e-5, atol=1e-5), (
        loss, ref_loss(y, y_prim))

    # 2) padded flat tail + multi-block grid + ragged-row masking path
    #    (small tile budget forces grid > 1).
    y_big = jax.nn.softmax(jax.random.normal(k3, (600, 40)), axis=-1)
    yp_big = jax.nn.softmax(jax.random.normal(k4, (600, 40)), axis=-1)
    loss_big = jax.block_until_ready(
        loss_cross_entropy(y_big, yp_big, target_tile_bytes=64 * 1024))
    assert jnp.allclose(loss_big, ref_loss(y_big, yp_big), rtol=1e-4, atol=1e-4), (
        loss_big, ref_loss(y_big, yp_big))

    # 3) native-dtype (bf16) pass-through.
    loss_bf16 = jax.block_until_ready(
        loss_cross_entropy(y.astype(jnp.bfloat16), y_prim.astype(jnp.bfloat16)))
    ref_bf16 = ref_loss(y.astype(jnp.bfloat16), y_prim.astype(jnp.bfloat16))
    assert jnp.allclose(loss_bf16, ref_bf16, rtol=1e-4, atol=1e-4), (loss_bf16, ref_bf16)

    # 4) default tile-size path exercising the ">= 2 blocks for v7x" split.
    y_med = jax.random.uniform(k5, (1100, 512), jnp.float32)
    yp_med = jax.random.uniform(k6, (1100, 512), jnp.float32, minval=1e-3, maxval=1.0)
    y_med = y_med / jnp.sum(y_med)
    yp_med = yp_med / jnp.sum(yp_med)
    loss_med = jax.block_until_ready(loss_cross_entropy(y_med, yp_med))
    assert jnp.allclose(loss_med, ref_loss(y_med, yp_med), rtol=1e-4, atol=1e-4), (
        loss_med, ref_loss(y_med, yp_med))

    print("KERNEL_OK")
</pallas_src>

<mosaic_0001>
module attributes {stable_mosaic.version = 11 : i64} {
  func.func @_ce_partial_kernel(%arg0: i32, %arg1: memref<1x128xf32, #tpu.memory_space<vmem>>, %arg2: memref<1x128xf32, #tpu.memory_space<vmem>>, %arg3: memref<1x1x128xf32, #tpu.memory_space<vmem>>) attributes {dimension_semantics = [#tpu.dimension_semantics<parallel>], iteration_bounds = array<i64: 1>, scalar_prefetch = 0 : i64, scratch_operands = 0 : i64, tpu.core_type = #tpu.core_type<tc>, window_params = [{transform_indices = @transform_0, window_bounds = array<i64: 1, 128>}, {transform_indices = @transform_1, window_bounds = array<i64: 1, 128>}, {transform_indices = @transform_2, window_bounds = array<i64: 1, 1, 128>}]} {
    %c0 = arith.constant 0 : index
    %c0_0 = arith.constant 0 : index
    %0 = vector.load %arg1[%c0, %c0_0] : memref<1x128xf32, #tpu.memory_space<vmem>>, vector<1x128xf32>
    %c0_1 = arith.constant 0 : index
    %c0_2 = arith.constant 0 : index
    %1 = vector.load %arg2[%c0_1, %c0_2] : memref<1x128xf32, #tpu.memory_space<vmem>>, vector<1x128xf32>
    %cst = arith.constant 9.99999968E-21 : f32
    %2 = vector.broadcast %cst : f32 to vector<1x128xf32>
    %3 = arith.addf %1, %2 : vector<1x128xf32>
    %4 = math.log %3 : vector<1x128xf32>
    %5 = arith.mulf %0, %4 : vector<1x128xf32>
    %cst_3 = arith.constant dense<0.000000e+00> : vector<128xf32>
    %6 = vector.multi_reduction <add>, %5, %cst_3 [0] : vector<1x128xf32> to vector<128xf32>
    %7 = vector.shape_cast %6 : vector<128xf32> to vector<1x128xf32>
    %8 = vector.shape_cast %7 : vector<1x128xf32> to vector<1x1x128xf32>
    %c0_4 = arith.constant 0 : index
    %c0_5 = arith.constant 0 : index
    %c0_6 = arith.constant 0 : index
    %9 = vector.load %arg3[%c0_4, %c0_5, %c0_6] : memref<1x1x128xf32, #tpu.memory_space<vmem>>, vector<1x1x128xf32>
    tpu.vector_store %arg3[%c0_4, %c0_5, %c0_6], %8 {strides = array<i32>} : memref<1x1x128xf32, #tpu.memory_space<vmem>>, vector<1x1x128xf32>,
    return
  }
  func.func @transform_0(%arg0: i32) -> (i32, i32) {
    %c0_i32 = arith.constant 0 : i32
    %c0_i32_0 = arith.constant 0 : i32
    return %arg0, %c0_i32 : i32, i32
  }
  func.func @transform_1(%arg0: i32) -> (i32, i32) {
    %c0_i32 = arith.constant 0 : i32
    %c0_i32_0 = arith.constant 0 : i32
    return %arg0, %c0_i32 : i32, i32
  }
  func.func @transform_2(%arg0: i32) -> (i32, i32, i32) {
    %c0_i32 = arith.constant 0 : i32
    %c0_i32_0 = arith.constant 0 : i32
    %c0_i32_1 = arith.constant 0 : i32
    return %arg0, %c0_i32, %c0_i32_0 : i32, i32, i32
  }
}

</mosaic_0001>

<bundles_post_ra>
// kernel: tpu_custom_call.1
= control target key start
LH: loop header
LB: loop body
LE: loop exit
PB: predicated region body
PF: predicated region fallthrough
CT: control target
= control target key end

     0   :  { %7 = vsyncpa [#allocation3], 0  ;;  %s143_s0 = inlined_call_operand.hbm [shape: f32[1,128], index: 0, kind: input, shape index: {}]   ;;  %s144_s1 = inlined_call_operand.vmem [shape: f32[1,128], index: 1, kind: input, shape index: {}]   ;;  %s145_s2 = inlined_call_operand.hbm [shape: f32[1,1,128], index: 2, kind: output, shape index: {}]  }
   0x1   :  { %8 = vsyncpa [#allocation4], 0  ;;  %s99_s9 = smov [#allocation2]   ;;  %s51_s13 = scalar_lea.hbm %s143_s0, 16 }
   0x2   :  { %s15_s10 = sshll.u32 %s99_s9, 4  ;;  %p52_p0 = scmp.ne.s32.totalorder %s143_s0, %s51_s13  ;;  %s16_s10 = int_to_ptr.vmem [resolvable:$true] %s15_s10 }
   0x3   :  { %p55_p1 = scmp.lt.u32.totalorder %s51_s13, %s143_s0 }
   0x5   :  { %p57_p2 = pnand %p55_p1, %p52_p0 }
   0x7   :  { %60 = shalt.err (!%p57_p2)
}
   0x8   :  { %s61_s18 = scalar_lea.vmem %s16_s10, 16  ;;  %s65_s19 = scalar_lea.vmem %s16_s10, 32 }
   0x9   :  { %p62_p3 = scmp.ne.s32.totalorder %s16_s10, %s61_s18  ;;  %p66_p4 = scmp.lt.s32.totalorder %s16_s10, %s16_s10 }
   0xa   :  { %p67_p5 = scmp.lt.s32.totalorder %s65_s19, %s61_s18 }
   0xc   :  { %p68_p6 = por %p67_p5, %p66_p4 }
   0xe   :  { %p69_p7 = pnand %p68_p6, %p62_p3 }
  0x10   :  { %72 = shalt.err (!%p69_p7)
}
  0x11   :  { %18 = dma.hbm_to_vmem [thread:$0]  %s143_s0, 16, %s16_s10, [#allocation3]  }
  0x12   :  { %95 = dma.done.wait [#allocation3], 16  }
  0x13   :  { %96 = vsyncadd [#allocation3], 4294967280  ;;  %v25_v0 = vld [vmem:[%s144_s1] sm:$0x1]  ;;  %s100_s24 = smov [#allocation5]  }
  0x14   :  { %v26_v1 = vadd.f32 1e-20, %v25_v0  ;;  %v24_v3 = vld [vmem:[#allocation2] sm:$0x1]  ;;  %s38_s25 = sshll.u32 %s100_s24, 4  ;;  %s39_s25 = int_to_ptr.vmem [resolvable:$true] %s38_s25 }
  0x15   :  { %s73_s26 = scalar_lea.vmem %s39_s25, 16  ;;  %s77_s27 = scalar_lea.vmem %s39_s25, 32 }
  0x16   :  { %49 = vlog2.f32 %v26_v1  ;;  %p74_p8 = scmp.ne.s32.totalorder %s39_s25, %s73_s26  ;;  %p78_p9 = scmp.lt.s32.totalorder %s39_s25, %s39_s25 }
  0x17   :  { %p79_p10 = scmp.lt.s32.totalorder %s77_s27, %s73_s26 }
  0x19   :  { %p80_p11 = por %p79_p10, %p78_p9 }
  0x1b   :  { %p81_p12 = pnand %p80_p11, %p74_p8 }
  0x20   :  { %v50_v2 = vpop.eup %49 }
  0x21   :  { %v28_v4 = vmul.f32 0.6931472, %v50_v2 }
  0x23   :  { %v29_v5 = vmul.f32 %v28_v4, %v24_v3 }
  0x25   :  { %31 = vst [vmem:[#allocation5] sm:$0x1] %v29_v5 }
  0x26   :  { %84 = shalt.err (!%p81_p12)
}
  0x27   :  { %s85_s28 = scalar_lea.hbm %s145_s2, 16 }
  0x28   :  { %p86_p13 = scmp.ne.s32.totalorder %s145_s2, %s85_s28  ;;  %p89_p0 = scmp.lt.u32.totalorder %s85_s28, %s145_s2 }
  0x2a   :  { %p91_p1 = pnand %p89_p0, %p86_p13 }
  0x2c   :  { %94 = shalt.err (!%p91_p1)
}
  0x2d   :  { %41 = dma.vmem_to_hbm [thread:$0]  %s39_s25, 16, %s145_s2, [#allocation4]  }
  0x2e   :  { %97 = dma.done.wait [#allocation4], 16  }
  0x2f   :  { %98 = vsyncadd [#allocation4], 4294967280 }
  0x30   :  { %45 = vsyncpa [#allocation3], 1 }
  0x31   :  { %46 = vsyncpa [#allocation4], 1 }

</bundles_post_ra>
